<compile_context>
chip_gen: v6e
topology: v6e:2x2x1
jax: 0.10.0
libtpu: 0.0.40
codegen_flags: <defaults>
</compile_context>

<pallas_src>
import jax
import jax.numpy as jnp
from jax import lax
from jax.experimental import pallas as pl
from jax.experimental.pallas import tpu as pltpu


def _fiction_kernel(x_ref, h0_ref, c0_ref, wih_ref, whh_ref, b_ref,
                    wlin_ref, blin_ref,
                    out_ref, hn_ref, cn_ref,
                    xw_ref, hs_ref):
    B, H = h0_ref.shape           # padded batch, hidden
    S = x_ref.shape[0] // B       # static number of time steps

    # --- One batched MXU pass for the input projection of ALL time steps (+ bias). ---
    xw_ref[...] = (jnp.dot(x_ref[...], wih_ref[...],
                           preferred_element_type=jnp.float32)
                   + b_ref[...])                          # (S*B, 4H)

    w_hh = whh_ref[...]                                   # hoisted (H, 4H)

    # --- Fully unrolled time recurrence (S static & small). ---
    h = h0_ref[...]
    c = c0_ref[...]
    for t in range(S):
        row = t * B                                       # sublane-aligned (B % 8 == 0)
        gates = (xw_ref[row:row + B, :]
                 + jnp.dot(h, w_hh, preferred_element_type=jnp.float32))  # (B, 4H)
        # Full-width activations, then per-gate slices (PyTorch order i, f, g, o).
        sig = jax.nn.sigmoid(gates)
        tnh = jnp.tanh(gates)
        i_g = sig[:, 0 * H:1 * H]
        f_g = sig[:, 1 * H:2 * H]
        g_g = tnh[:, 2 * H:3 * H]
        o_g = sig[:, 3 * H:4 * H]
        c = f_g * c + i_g * g_g
        h = o_g * jnp.tanh(c)
        hs_ref[row:row + B, :] = h                        # keep h_t for deferred proj.

    # Final LSTM state written exactly once.
    hn_ref[...] = h.astype(hn_ref.dtype)
    cn_ref[...] = c.astype(cn_ref.dtype)

    # --- Deferred Linear + log_softmax: one MXU pass, one batched lane-dense softmax. ---
    logits = (jnp.dot(hs_ref[...], wlin_ref[...],
                      preferred_element_type=jnp.float32)
              + blin_ref[...])                            # (S*B, O_pad)
    m = jnp.max(logits, axis=-1, keepdims=True)
    lse = jnp.log(jnp.sum(jnp.exp(logits - m), axis=-1, keepdims=True)) + m
    out_ref[...] = (logits - lse).astype(out_ref.dtype)


def fiction_generator_forward(x, hidden, params):
    """x: (S, B, I) f32. hidden: (h0, c0), each (1, B, H).
    Returns (log_probs (S*B, O), (h_n (1, B, H), c_n (1, B, H)))."""
    h0, c0 = hidden
    S, B, I = x.shape
    H = h0.shape[-1]
    O = params["w_lin"].shape[-1]

    B_pad = ((B + 7) // 8) * 8          # sublane multiple
    O_pad = ((O + 127) // 128) * 128    # lane-dense output slab

    xp = x
    h0p, c0p = h0[0], c0[0]
    if B_pad != B:
        db = B_pad - B
        xp = jnp.pad(xp, ((0, 0), (0, db), (0, 0)))
        h0p = jnp.pad(h0p, ((0, db), (0, 0)))
        c0p = jnp.pad(c0p, ((0, db), (0, 0)))
    x_flat = xp.reshape(S * B_pad, I)   # time-major rows, matches x.view(-1, H) ordering

    w_lin, b_lin = params["w_lin"], params["b_lin"]
    if O_pad != O:
        w_lin = jnp.pad(w_lin, ((0, 0), (0, O_pad - O)))
        # Huge negative bias on padded columns -> exp() underflows to 0, so the
        # log_softmax over the lane-dense slab equals the softmax over the real O cols.
        b_lin = jnp.pad(b_lin, ((0, 0), (0, O_pad - O)), constant_values=-1e30)

    grid_spec = pltpu.PrefetchScalarGridSpec(
        num_scalar_prefetch=0,
        grid=(1,),                                         # collapsed time grid
        in_specs=[
            pl.BlockSpec((S * B_pad, I), lambda i: (0, 0)),     # x (flattened)
            pl.BlockSpec((B_pad, H), lambda i: (0, 0)),         # h0
            pl.BlockSpec((B_pad, H), lambda i: (0, 0)),         # c0
            pl.BlockSpec((I, 4 * H), lambda i: (0, 0)),         # W_ih
            pl.BlockSpec((H, 4 * H), lambda i: (0, 0)),         # W_hh
            pl.BlockSpec((1, 4 * H), lambda i: (0, 0)),         # b = b_ih + b_hh
            pl.BlockSpec((H, O_pad), lambda i: (0, 0)),         # W_lin (lane padded)
            pl.BlockSpec((1, O_pad), lambda i: (0, 0)),         # b_lin (lane padded)
        ],
        out_specs=[
            pl.BlockSpec((S * B_pad, O_pad), lambda i: (0, 0)), # log_probs slab
            pl.BlockSpec((B_pad, H), lambda i: (0, 0)),         # h_n
            pl.BlockSpec((B_pad, H), lambda i: (0, 0)),         # c_n
        ],
        scratch_shapes=[
            pltpu.VMEM((S * B_pad, 4 * H), jnp.float32),        # x @ W_ih + b, all steps
            pltpu.VMEM((S * B_pad, H), jnp.float32),            # h_t history
        ],
    )

    out_shapes = (
        jax.ShapeDtypeStruct((S * B_pad, O_pad), jnp.float32),
        jax.ShapeDtypeStruct((B_pad, H), jnp.float32),
        jax.ShapeDtypeStruct((B_pad, H), jnp.float32),
    )

    logp_pad, h_n, c_n = pl.pallas_call(
        _fiction_kernel,
        out_shape=out_shapes,
        grid_spec=grid_spec,
        compiler_params=pltpu.CompilerParams(
            dimension_semantics=("arbitrary",)),
    )(x_flat, h0p, c0p, params["w_ih"], params["w_hh"], params["b"],
      w_lin, b_lin)

    logp = logp_pad.reshape(S, B_pad, O_pad)[:, :B, :O].reshape(S * B, O)
    return logp, (h_n[:B][None], c_n[:B][None])


def init_params(key, input_size, hidden_size, output_size):
    ks = jax.random.split(key, 6)
    bound = 1.0 / jnp.sqrt(hidden_size)
    u = lambda k, shape: jax.random.uniform(k, shape, jnp.float32, -bound, bound)
    # Stored transposed for (B,K)@(K,N) matmuls; gate order i, f, g, o.
    w_ih = u(ks[0], (input_size, 4 * hidden_size))
    w_hh = u(ks[1], (hidden_size, 4 * hidden_size))
    b_ih = u(ks[2], (1, 4 * hidden_size))
    b_hh = u(ks[3], (1, 4 * hidden_size))
    w_lin = u(ks[4], (hidden_size, output_size))
    b_lin = u(ks[5], (1, output_size))
    return {"w_ih": w_ih, "w_hh": w_hh, "b": b_ih + b_hh,
            "w_lin": w_lin, "b_lin": b_lin}


def _reference_forward(x, hidden, params):
    """Pure-JAX reference matching torch.nn.LSTM + Linear + log_softmax."""
    h, c = hidden[0][0], hidden[1][0]
    H = h.shape[-1]
    hp = lambda a, b: jnp.dot(a, b, precision=lax.Precision.HIGHEST)
    outs = []
    for t in range(x.shape[0]):
        g = hp(x[t], params["w_ih"]) + hp(h, params["w_hh"]) + params["b"]
        i = jax.nn.sigmoid(g[:, 0 * H:1 * H])
        f = jax.nn.sigmoid(g[:, 1 * H:2 * H])
        gg = jnp.tanh(g[:, 2 * H:3 * H])
        o = jax.nn.sigmoid(g[:, 3 * H:4 * H])
        c = f * c + i * gg
        h = o * jnp.tanh(c)
        outs.append(h)
    hs = jnp.stack(outs, 0).reshape(-1, H)
    logits = hp(hs, params["w_lin"]) + params["b_lin"]
    return jax.nn.log_softmax(logits, axis=1), (h[None], c[None])


if __name__ == "__main__":
    # Small shapes consistent with the module's forward:
    # x: (seq, batch, n_letters), hidden: ((1, batch, H), (1, batch, H)).
    seq = 8
    input_size = 16          # n_letters (synthetic)
    hidden_size = 32
    output_size = input_size

    key = jax.random.PRNGKey(0)
    k_p, k_x = jax.random.split(key, 2)
    params = init_params(k_p, input_size, hidden_size, output_size)

    # batch=8 exercises the sublane-aligned path; batch=3 exercises batch padding.
    for batch in (8, 3):
        kx, kh, kc = jax.random.split(jax.random.fold_in(k_x, batch), 3)
        x = jax.random.normal(kx, (seq, batch, input_size), jnp.float32)
        h0 = jax.random.normal(kh, (1, batch, hidden_size), jnp.float32)
        c0 = jax.random.normal(kc, (1, batch, hidden_size), jnp.float32)

        logp, (h_n, c_n) = fiction_generator_forward(x, (h0, c0), params)
        jax.block_until_ready((logp, h_n, c_n))

        ref_logp, (ref_h, ref_c) = _reference_forward(x, (h0, c0), params)
        assert logp.shape == (seq * batch, output_size)
        assert h_n.shape == (1, batch, hidden_size)
        assert c_n.shape == (1, batch, hidden_size)
        assert jnp.allclose(logp, ref_logp, atol=1e-4), \
            float(jnp.max(jnp.abs(logp - ref_logp)))
        assert jnp.allclose(h_n, ref_h, atol=1e-4)
        assert jnp.allclose(c_n, ref_c, atol=1e-4)

    print("KERNEL_OK")
</pallas_src>

<mosaic_0001>
module attributes {stable_mosaic.version = 11 : i64} {
  func.func @_fiction_kernel(%arg0: i32, %arg1: memref<64x16xf32, #tpu.memory_space<vmem>>, %arg2: memref<8x32xf32, #tpu.memory_space<vmem>>, %arg3: memref<8x32xf32, #tpu.memory_space<vmem>>, %arg4: memref<16x128xf32, #tpu.memory_space<vmem>>, %arg5: memref<32x128xf32, #tpu.memory_space<vmem>>, %arg6: memref<1x128xf32, #tpu.memory_space<vmem>>, %arg7: memref<32x128xf32, #tpu.memory_space<vmem>>, %arg8: memref<1x128xf32, #tpu.memory_space<vmem>>, %arg9: memref<64x128xf32, #tpu.memory_space<vmem>>, %arg10: memref<8x32xf32, #tpu.memory_space<vmem>>, %arg11: memref<8x32xf32, #tpu.memory_space<vmem>>, %arg12: memref<64x128xf32, #tpu.memory_space<vmem>>, %arg13: memref<64x32xf32, #tpu.memory_space<vmem>>) attributes {dimension_semantics = [#tpu.dimension_semantics<arbitrary>], iteration_bounds = array<i64: 1>, scalar_prefetch = 0 : i64, scratch_operands = 2 : i64, tpu.core_type = #tpu.core_type<tc>, window_params = [{pipeline_mode = #tpu.pipeline_mode<synchronous>, transform_indices = @transform_0, window_bounds = array<i64: 64, 16>}, {pipeline_mode = #tpu.pipeline_mode<synchronous>, transform_indices = @transform_1, window_bounds = array<i64: 8, 32>}, {pipeline_mode = #tpu.pipeline_mode<synchronous>, transform_indices = @transform_2, window_bounds = array<i64: 8, 32>}, {pipeline_mode = #tpu.pipeline_mode<synchronous>, transform_indices = @transform_3, window_bounds = array<i64: 16, 128>}, {pipeline_mode = #tpu.pipeline_mode<synchronous>, transform_indices = @transform_4, window_bounds = array<i64: 32, 128>}, {pipeline_mode = #tpu.pipeline_mode<synchronous>, transform_indices = @transform_5, window_bounds = array<i64: 1, 128>}, {pipeline_mode = #tpu.pipeline_mode<synchronous>, transform_indices = @transform_6, window_bounds = array<i64: 32, 128>}, {pipeline_mode = #tpu.pipeline_mode<synchronous>, transform_indices = @transform_7, window_bounds = array<i64: 1, 128>}, {pipeline_mode = #tpu.pipeline_mode<synchronous>, transform_indices = @transform_8, window_bounds = array<i64: 64, 128>}, {pipeline_mode = #tpu.pipeline_mode<synchronous>, transform_indices = @transform_9, window_bounds = array<i64: 8, 32>}, {pipeline_mode = #tpu.pipeline_mode<synchronous>, transform_indices = @transform_10, window_bounds = array<i64: 8, 32>}]} {
    %c0 = arith.constant 0 : index
    %c0_0 = arith.constant 0 : index
    %0 = vector.load %arg1[%c0, %c0_0] : memref<64x16xf32, #tpu.memory_space<vmem>>, vector<64x16xf32>
    %c0_1 = arith.constant 0 : index
    %c0_2 = arith.constant 0 : index
    %1 = vector.load %arg4[%c0_1, %c0_2] : memref<16x128xf32, #tpu.memory_space<vmem>>, vector<16x128xf32>
    %cst = arith.constant dense<0.000000e+00> : vector<64x128xf32>
    %2 = tpu.matmul %0, %1, %cst {dimension_numbers = #tpu.dot_dimension_numbers<[1], [0], [0], [1], [0, 0, 1, 1], [], []>} : vector<64x16xf32>, vector<16x128xf32>, vector<64x128xf32> -> vector<64x128xf32>
    %c0_3 = arith.constant 0 : index
    %c0_4 = arith.constant 0 : index
    %3 = vector.load %arg6[%c0_3, %c0_4] : memref<1x128xf32, #tpu.memory_space<vmem>>, vector<1x128xf32>
    %4 = vector.broadcast %3 : vector<1x128xf32> to vector<64x128xf32>
    %5 = arith.addf %2, %4 : vector<64x128xf32>
    %c0_5 = arith.constant 0 : index
    %c0_6 = arith.constant 0 : index
    %6 = vector.load %arg12[%c0_5, %c0_6] : memref<64x128xf32, #tpu.memory_space<vmem>>, vector<64x128xf32>
    tpu.vector_store %arg12[%c0_5, %c0_6], %5 {strides = array<i32>} : memref<64x128xf32, #tpu.memory_space<vmem>>, vector<64x128xf32>,
    %c0_7 = arith.constant 0 : index
    %c0_8 = arith.constant 0 : index
    %7 = vector.load %arg5[%c0_7, %c0_8] : memref<32x128xf32, #tpu.memory_space<vmem>>, vector<32x128xf32>
    %c0_9 = arith.constant 0 : index
    %c0_10 = arith.constant 0 : index
    %8 = vector.load %arg2[%c0_9, %c0_10] : memref<8x32xf32, #tpu.memory_space<vmem>>, vector<8x32xf32>
    %c0_11 = arith.constant 0 : index
    %c0_12 = arith.constant 0 : index
    %9 = vector.load %arg3[%c0_11, %c0_12] : memref<8x32xf32, #tpu.memory_space<vmem>>, vector<8x32xf32>
    %c0_13 = arith.constant 0 : index
    %c0_14 = arith.constant 0 : index
    %10 = vector.load %arg12[%c0_13, %c0_14] : memref<64x128xf32, #tpu.memory_space<vmem>>, vector<8x128xf32>
    %cst_15 = arith.constant dense<0.000000e+00> : vector<8x128xf32>
    %11 = tpu.matmul %8, %7, %cst_15 {dimension_numbers = #tpu.dot_dimension_numbers<[1], [0], [0], [1], [0, 0, 1, 1], [], []>} : vector<8x32xf32>, vector<32x128xf32>, vector<8x128xf32> -> vector<8x128xf32>
    %12 = arith.addf %10, %11 : vector<8x128xf32>
    %13 = arith.negf %12 : vector<8x128xf32>
    %14 = math.exp %13 : vector<8x128xf32>
    %cst_16 = arith.constant 1.000000e+00 : f32
    %15 = vector.broadcast %cst_16 : f32 to vector<8x128xf32>
    %16 = arith.addf %15, %14 : vector<8x128xf32>
    %17 = arith.divf %15, %16 : vector<8x128xf32>
    %18 = math.tanh %12 : vector<8x128xf32>
    %19 = vector.extract_strided_slice %17 {offsets = [0, 0], sizes = [8, 32], strides = [1, 1]} : vector<8x128xf32> to vector<8x32xf32>
    %20 = vector.extract_strided_slice %17 {offsets = [0, 32], sizes = [8, 32], strides = [1, 1]} : vector<8x128xf32> to vector<8x32xf32>
    %21 = vector.extract_strided_slice %18 {offsets = [0, 64], sizes = [8, 32], strides = [1, 1]} : vector<8x128xf32> to vector<8x32xf32>
    %22 = vector.extract_strided_slice %17 {offsets = [0, 96], sizes = [8, 32], strides = [1, 1]} : vector<8x128xf32> to vector<8x32xf32>
    %23 = arith.mulf %20, %9 : vector<8x32xf32>
    %24 = arith.mulf %19, %21 : vector<8x32xf32>
    %25 = arith.addf %23, %24 : vector<8x32xf32>
    %26 = math.tanh %25 : vector<8x32xf32>
    %27 = arith.mulf %22, %26 : vector<8x32xf32>
    %c0_17 = arith.constant 0 : index
    %c0_18 = arith.constant 0 : index
    %28 = vector.load %arg13[%c0_17, %c0_18] : memref<64x32xf32, #tpu.memory_space<vmem>>, vector<8x32xf32>
    tpu.vector_store %arg13[%c0_17, %c0_18], %27 {strides = array<i32>} : memref<64x32xf32, #tpu.memory_space<vmem>>, vector<8x32xf32>,
    %c8 = arith.constant 8 : index
    %c0_19 = arith.constant 0 : index
    %29 = vector.load %arg12[%c8, %c0_19] : memref<64x128xf32, #tpu.memory_space<vmem>>, vector<8x128xf32>
    %cst_20 = arith.constant dense<0.000000e+00> : vector<8x128xf32>
    %30 = tpu.matmul %27, %7, %cst_20 {dimension_numbers = #tpu.dot_dimension_numbers<[1], [0], [0], [1], [0, 0, 1, 1], [], []>} : vector<8x32xf32>, vector<32x128xf32>, vector<8x128xf32> -> vector<8x128xf32>
    %31 = arith.addf %29, %30 : vector<8x128xf32>
    %32 = arith.negf %31 : vector<8x128xf32>
    %33 = math.exp %32 : vector<8x128xf32>
    %cst_21 = arith.constant 1.000000e+00 : f32
    %34 = vector.broadcast %cst_21 : f32 to vector<8x128xf32>
    %35 = arith.addf %34, %33 : vector<8x128xf32>
    %36 = arith.divf %34, %35 : vector<8x128xf32>
    %37 = math.tanh %31 : vector<8x128xf32>
    %38 = vector.extract_strided_slice %36 {offsets = [0, 0], sizes = [8, 32], strides = [1, 1]} : vector<8x128xf32> to vector<8x32xf32>
    %39 = vector.extract_strided_slice %36 {offsets = [0, 32], sizes = [8, 32], strides = [1, 1]} : vector<8x128xf32> to vector<8x32xf32>
    %40 = vector.extract_strided_slice %37 {offsets = [0, 64], sizes = [8, 32], strides = [1, 1]} : vector<8x128xf32> to vector<8x32xf32>
    %41 = vector.extract_strided_slice %36 {offsets = [0, 96], sizes = [8, 32], strides = [1, 1]} : vector<8x128xf32> to vector<8x32xf32>
    %42 = arith.mulf %39, %25 : vector<8x32xf32>
    %43 = arith.mulf %38, %40 : vector<8x32xf32>
    %44 = arith.addf %42, %43 : vector<8x32xf32>
    %45 = math.tanh %44 : vector<8x32xf32>
    %46 = arith.mulf %41, %45 : vector<8x32xf32>
    %c8_22 = arith.constant 8 : index
    %c0_23 = arith.constant 0 : index
    %47 = vector.load %arg13[%c8_22, %c0_23] : memref<64x32xf32, #tpu.memory_space<vmem>>, vector<8x32xf32>
    tpu.vector_store %arg13[%c8_22, %c0_23], %46 {strides = array<i32>} : memref<64x32xf32, #tpu.memory_space<vmem>>, vector<8x32xf32>,
    %c16 = arith.constant 16 : index
    %c0_24 = arith.constant 0 : index
    %48 = vector.load %arg12[%c16, %c0_24] : memref<64x128xf32, #tpu.memory_space<vmem>>, vector<8x128xf32>
    %cst_25 = arith.constant dense<0.000000e+00> : vector<8x128xf32>
    %49 = tpu.matmul %46, %7, %cst_25 {dimension_numbers = #tpu.dot_dimension_numbers<[1], [0], [0], [1], [0, 0, 1, 1], [], []>} : vector<8x32xf32>, vector<32x128xf32>, vector<8x128xf32> -> vector<8x128xf32>
    %50 = arith.addf %48, %49 : vector<8x128xf32>
    %51 = arith.negf %50 : vector<8x128xf32>
    %52 = math.exp %51 : vector<8x128xf32>
    %cst_26 = arith.constant 1.000000e+00 : f32
    %53 = vector.broadcast %cst_26 : f32 to vector<8x128xf32>
    %54 = arith.addf %53, %52 : vector<8x128xf32>
    %55 = arith.divf %53, %54 : vector<8x128xf32>
    %56 = math.tanh %50 : vector<8x128xf32>
    %57 = vector.extract_strided_slice %55 {offsets = [0, 0], sizes = [8, 32], strides = [1, 1]} : vector<8x128xf32> to vector<8x32xf32>
    %58 = vector.extract_strided_slice %55 {offsets = [0, 32], sizes = [8, 32], strides = [1, 1]} : vector<8x128xf32> to vector<8x32xf32>
    %59 = vector.extract_strided_slice %56 {offsets = [0, 64], sizes = [8, 32], strides = [1, 1]} : vector<8x128xf32> to vector<8x32xf32>
    %60 = vector.extract_strided_slice %55 {offsets = [0, 96], sizes = [8, 32], strides = [1, 1]} : vector<8x128xf32> to vector<8x32xf32>
    %61 = arith.mulf %58, %44 : vector<8x32xf32>
    %62 = arith.mulf %57, %59 : vector<8x32xf32>
    %63 = arith.addf %61, %62 : vector<8x32xf32>
    %64 = math.tanh %63 : vector<8x32xf32>
    %65 = arith.mulf %60, %64 : vector<8x32xf32>
    %c16_27 = arith.constant 16 : index
    %c0_28 = arith.constant 0 : index
    %66 = vector.load %arg13[%c16_27, %c0_28] : memref<64x32xf32, #tpu.memory_space<vmem>>, vector<8x32xf32>
    tpu.vector_store %arg13[%c16_27, %c0_28], %65 {strides = array<i32>} : memref<64x32xf32, #tpu.memory_space<vmem>>, vector<8x32xf32>,
    %c24 = arith.constant 24 : index
    %c0_29 = arith.constant 0 : index
    %67 = vector.load %arg12[%c24, %c0_29] : memref<64x128xf32, #tpu.memory_space<vmem>>, vector<8x128xf32>
    %cst_30 = arith.constant dense<0.000000e+00> : vector<8x128xf32>
    %68 = tpu.matmul %65, %7, %cst_30 {dimension_numbers = #tpu.dot_dimension_numbers<[1], [0], [0], [1], [0, 0, 1, 1], [], []>} : vector<8x32xf32>, vector<32x128xf32>, vector<8x128xf32> -> vector<8x128xf32>
    %69 = arith.addf %67, %68 : vector<8x128xf32>
    %70 = arith.negf %69 : vector<8x128xf32>
    %71 = math.exp %70 : vector<8x128xf32>
    %cst_31 = arith.constant 1.000000e+00 : f32
    %72 = vector.broadcast %cst_31 : f32 to vector<8x128xf32>
    %73 = arith.addf %72, %71 : vector<8x128xf32>
    %74 = arith.divf %72, %73 : vector<8x128xf32>
    %75 = math.tanh %69 : vector<8x128xf32>
    %76 = vector.extract_strided_slice %74 {offsets = [0, 0], sizes = [8, 32], strides = [1, 1]} : vector<8x128xf32> to vector<8x32xf32>
    %77 = vector.extract_strided_slice %74 {offsets = [0, 32], sizes = [8, 32], strides = [1, 1]} : vector<8x128xf32> to vector<8x32xf32>
    %78 = vector.extract_strided_slice %75 {offsets = [0, 64], sizes = [8, 32], strides = [1, 1]} : vector<8x128xf32> to vector<8x32xf32>
    %79 = vector.extract_strided_slice %74 {offsets = [0, 96], sizes = [8, 32], strides = [1, 1]} : vector<8x128xf32> to vector<8x32xf32>
    %80 = arith.mulf %77, %63 : vector<8x32xf32>
    %81 = arith.mulf %76, %78 : vector<8x32xf32>
    %82 = arith.addf %80, %81 : vector<8x32xf32>
    %83 = math.tanh %82 : vector<8x32xf32>
    %84 = arith.mulf %79, %83 : vector<8x32xf32>
    %c24_32 = arith.constant 24 : index
    %c0_33 = arith.constant 0 : index
    %85 = vector.load %arg13[%c24_32, %c0_33] : memref<64x32xf32, #tpu.memory_space<vmem>>, vector<8x32xf32>
    tpu.vector_store %arg13[%c24_32, %c0_33], %84 {strides = array<i32>} : memref<64x32xf32, #tpu.memory_space<vmem>>, vector<8x32xf32>,
    %c32 = arith.constant 32 : index
    %c0_34 = arith.constant 0 : index
    %86 = vector.load %arg12[%c32, %c0_34] : memref<64x128xf32, #tpu.memory_space<vmem>>, vector<8x128xf32>
    %cst_35 = arith.constant dense<0.000000e+00> : vector<8x128xf32>
    %87 = tpu.matmul %84, %7, %cst_35 {dimension_numbers = #tpu.dot_dimension_numbers<[1], [0], [0], [1], [0, 0, 1, 1], [], []>} : vector<8x32xf32>, vector<32x128xf32>, vector<8x128xf32> -> vector<8x128xf32>
    %88 = arith.addf %86, %87 : vector<8x128xf32>
    %89 = arith.negf %88 : vector<8x128xf32>
    %90 = math.exp %89 : vector<8x128xf32>
    %cst_36 = arith.constant 1.000000e+00 : f32
    %91 = vector.broadcast %cst_36 : f32 to vector<8x128xf32>
    %92 = arith.addf %91, %90 : vector<8x128xf32>
    %93 = arith.divf %91, %92 : vector<8x128xf32>
    %94 = math.tanh %88 : vector<8x128xf32>
    %95 = vector.extract_strided_slice %93 {offsets = [0, 0], sizes = [8, 32], strides = [1, 1]} : vector<8x128xf32> to vector<8x32xf32>
    %96 = vector.extract_strided_slice %93 {offsets = [0, 32], sizes = [8, 32], strides = [1, 1]} : vector<8x128xf32> to vector<8x32xf32>
    %97 = vector.extract_strided_slice %94 {offsets = [0, 64], sizes = [8, 32], strides = [1, 1]} : vector<8x128xf32> to vector<8x32xf32>
    %98 = vector.extract_strided_slice %93 {offsets = [0, 96], sizes = [8, 32], strides = [1, 1]} : vector<8x128xf32> to vector<8x32xf32>
    %99 = arith.mulf %96, %82 : vector<8x32xf32>
    %100 = arith.mulf %95, %97 : vector<8x32xf32>
    %101 = arith.addf %99, %100 : vector<8x32xf32>
    %102 = math.tanh %101 : vector<8x32xf32>
    %103 = arith.mulf %98, %102 : vector<8x32xf32>
    %c32_37 = arith.constant 32 : index
    %c0_38 = arith.constant 0 : index
    %104 = vector.load %arg13[%c32_37, %c0_38] : memref<64x32xf32, #tpu.memory_space<vmem>>, vector<8x32xf32>
    tpu.vector_store %arg13[%c32_37, %c0_38], %103 {strides = array<i32>} : memref<64x32xf32, #tpu.memory_space<vmem>>, vector<8x32xf32>,
    %c40 = arith.constant 40 : index
    %c0_39 = arith.constant 0 : index
    %105 = vector.load %arg12[%c40, %c0_39] : memref<64x128xf32, #tpu.memory_space<vmem>>, vector<8x128xf32>
    %cst_40 = arith.constant dense<0.000000e+00> : vector<8x128xf32>
    %106 = tpu.matmul %103, %7, %cst_40 {dimension_numbers = #tpu.dot_dimension_numbers<[1], [0], [0], [1], [0, 0, 1, 1], [], []>} : vector<8x32xf32>, vector<32x128xf32>, vector<8x128xf32> -> vector<8x128xf32>
    %107 = arith.addf %105, %106 : vector<8x128xf32>
    %108 = arith.negf %107 : vector<8x128xf32>
    %109 = math.exp %108 : vector<8x128xf32>
    %cst_41 = arith.constant 1.000000e+00 : f32
    %110 = vector.broadcast %cst_41 : f32 to vector<8x128xf32>
    %111 = arith.addf %110, %109 : vector<8x128xf32>
    %112 = arith.divf %110, %111 : vector<8x128xf32>
    %113 = math.tanh %107 : vector<8x128xf32>
    %114 = vector.extract_strided_slice %112 {offsets = [0, 0], sizes = [8, 32], strides = [1, 1]} : vector<8x128xf32> to vector<8x32xf32>
    %115 = vector.extract_strided_slice %112 {offsets = [0, 32], sizes = [8, 32], strides = [1, 1]} : vector<8x128xf32> to vector<8x32xf32>
    %116 = vector.extract_strided_slice %113 {offsets = [0, 64], sizes = [8, 32], strides = [1, 1]} : vector<8x128xf32> to vector<8x32xf32>
    %117 = vector.extract_strided_slice %112 {offsets = [0, 96], sizes = [8, 32], strides = [1, 1]} : vector<8x128xf32> to vector<8x32xf32>
    %118 = arith.mulf %115, %101 : vector<8x32xf32>
    %119 = arith.mulf %114, %116 : vector<8x32xf32>
    %120 = arith.addf %118, %119 : vector<8x32xf32>
    %121 = math.tanh %120 : vector<8x32xf32>
    %122 = arith.mulf %117, %121 : vector<8x32xf32>
    %c40_42 = arith.constant 40 : index
    %c0_43 = arith.constant 0 : index
    %123 = vector.load %arg13[%c40_42, %c0_43] : memref<64x32xf32, #tpu.memory_space<vmem>>, vector<8x32xf32>
    tpu.vector_store %arg13[%c40_42, %c0_43], %122 {strides = array<i32>} : memref<64x32xf32, #tpu.memory_space<vmem>>, vector<8x32xf32>,
    %c48 = arith.constant 48 : index
    %c0_44 = arith.constant 0 : index
    %124 = vector.load %arg12[%c48, %c0_44] : memref<64x128xf32, #tpu.memory_space<vmem>>, vector<8x128xf32>
    %cst_45 = arith.constant dense<0.000000e+00> : vector<8x128xf32>
    %125 = tpu.matmul %122, %7, %cst_45 {dimension_numbers = #tpu.dot_dimension_numbers<[1], [0], [0], [1], [0, 0, 1, 1], [], []>} : vector<8x32xf32>, vector<32x128xf32>, vector<8x128xf32> -> vector<8x128xf32>
    %126 = arith.addf %124, %125 : vector<8x128xf32>
    %127 = arith.negf %126 : vector<8x128xf32>
    %128 = math.exp %127 : vector<8x128xf32>
    %cst_46 = arith.constant 1.000000e+00 : f32
    %129 = vector.broadcast %cst_46 : f32 to vector<8x128xf32>
    %130 = arith.addf %129, %128 : vector<8x128xf32>
    %131 = arith.divf %129, %130 : vector<8x128xf32>
    %132 = math.tanh %126 : vector<8x128xf32>
    %133 = vector.extract_strided_slice %131 {offsets = [0, 0], sizes = [8, 32], strides = [1, 1]} : vector<8x128xf32> to vector<8x32xf32>
    %134 = vector.extract_strided_slice %131 {offsets = [0, 32], sizes = [8, 32], strides = [1, 1]} : vector<8x128xf32> to vector<8x32xf32>
    %135 = vector.extract_strided_slice %132 {offsets = [0, 64], sizes = [8, 32], strides = [1, 1]} : vector<8x128xf32> to vector<8x32xf32>
    %136 = vector.extract_strided_slice %131 {offsets = [0, 96], sizes = [8, 32], strides = [1, 1]} : vector<8x128xf32> to vector<8x32xf32>
    %137 = arith.mulf %134, %120 : vector<8x32xf32>
    %138 = arith.mulf %133, %135 : vector<8x32xf32>
    %139 = arith.addf %137, %138 : vector<8x32xf32>
    %140 = math.tanh %139 : vector<8x32xf32>
    %141 = arith.mulf %136, %140 : vector<8x32xf32>
    %c48_47 = arith.constant 48 : index
    %c0_48 = arith.constant 0 : index
    %142 = vector.load %arg13[%c48_47, %c0_48] : memref<64x32xf32, #tpu.memory_space<vmem>>, vector<8x32xf32>
    tpu.vector_store %arg13[%c48_47, %c0_48], %141 {strides = array<i32>} : memref<64x32xf32, #tpu.memory_space<vmem>>, vector<8x32xf32>,
    %c56 = arith.constant 56 : index
    %c0_49 = arith.constant 0 : index
    %143 = vector.load %arg12[%c56, %c0_49] : memref<64x128xf32, #tpu.memory_space<vmem>>, vector<8x128xf32>
    %cst_50 = arith.constant dense<0.000000e+00> : vector<8x128xf32>
    %144 = tpu.matmul %141, %7, %cst_50 {dimension_numbers = #tpu.dot_dimension_numbers<[1], [0], [0], [1], [0, 0, 1, 1], [], []>} : vector<8x32xf32>, vector<32x128xf32>, vector<8x128xf32> -> vector<8x128xf32>
    %145 = arith.addf %143, %144 : vector<8x128xf32>
    %146 = arith.negf %145 : vector<8x128xf32>
    %147 = math.exp %146 : vector<8x128xf32>
    %cst_51 = arith.constant 1.000000e+00 : f32
    %148 = vector.broadcast %cst_51 : f32 to vector<8x128xf32>
    %149 = arith.addf %148, %147 : vector<8x128xf32>
    %150 = arith.divf %148, %149 : vector<8x128xf32>
    %151 = math.tanh %145 : vector<8x128xf32>
    %152 = vector.extract_strided_slice %150 {offsets = [0, 0], sizes = [8, 32], strides = [1, 1]} : vector<8x128xf32> to vector<8x32xf32>
    %153 = vector.extract_strided_slice %150 {offsets = [0, 32], sizes = [8, 32], strides = [1, 1]} : vector<8x128xf32> to vector<8x32xf32>
    %154 = vector.extract_strided_slice %151 {offsets = [0, 64], sizes = [8, 32], strides = [1, 1]} : vector<8x128xf32> to vector<8x32xf32>
    %155 = vector.extract_strided_slice %150 {offsets = [0, 96], sizes = [8, 32], strides = [1, 1]} : vector<8x128xf32> to vector<8x32xf32>
    %156 = arith.mulf %153, %139 : vector<8x32xf32>
    %157 = arith.mulf %152, %154 : vector<8x32xf32>
    %158 = arith.addf %156, %157 : vector<8x32xf32>
    %159 = math.tanh %158 : vector<8x32xf32>
    %160 = arith.mulf %155, %159 : vector<8x32xf32>
    %c56_52 = arith.constant 56 : index
    %c0_53 = arith.constant 0 : index
    %161 = vector.load %arg13[%c56_52, %c0_53] : memref<64x32xf32, #tpu.memory_space<vmem>>, vector<8x32xf32>
    tpu.vector_store %arg13[%c56_52, %c0_53], %160 {strides = array<i32>} : memref<64x32xf32, #tpu.memory_space<vmem>>, vector<8x32xf32>,
    %c0_54 = arith.constant 0 : index
    %c0_55 = arith.constant 0 : index
    %162 = vector.load %arg10[%c0_54, %c0_55] : memref<8x32xf32, #tpu.memory_space<vmem>>, vector<8x32xf32>
    tpu.vector_store %arg10[%c0_54, %c0_55], %160 {strides = array<i32>} : memref<8x32xf32, #tpu.memory_space<vmem>>, vector<8x32xf32>,
    %c0_56 = arith.constant 0 : index
    %c0_57 = arith.constant 0 : index
    %163 = vector.load %arg11[%c0_56, %c0_57] : memref<8x32xf32, #tpu.memory_space<vmem>>, vector<8x32xf32>
    tpu.vector_store %arg11[%c0_56, %c0_57], %158 {strides = array<i32>} : memref<8x32xf32, #tpu.memory_space<vmem>>, vector<8x32xf32>,
    %c0_58 = arith.constant 0 : index
    %c0_59 = arith.constant 0 : index
    %164 = vector.load %arg13[%c0_58, %c0_59] : memref<64x32xf32, #tpu.memory_space<vmem>>, vector<64x32xf32>
    %c0_60 = arith.constant 0 : index
    %c0_61 = arith.constant 0 : index
    %165 = vector.load %arg7[%c0_60, %c0_61] : memref<32x128xf32, #tpu.memory_space<vmem>>, vector<32x128xf32>
    %cst_62 = arith.constant dense<0.000000e+00> : vector<64x128xf32>
    %166 = tpu.matmul %164, %165, %cst_62 {dimension_numbers = #tpu.dot_dimension_numbers<[1], [0], [0], [1], [0, 0, 1, 1], [], []>} : vector<64x32xf32>, vector<32x128xf32>, vector<64x128xf32> -> vector<64x128xf32>
    %c0_63 = arith.constant 0 : index
    %c0_64 = arith.constant 0 : index
    %167 = vector.load %arg8[%c0_63, %c0_64] : memref<1x128xf32, #tpu.memory_space<vmem>>, vector<1x128xf32>
    %168 = vector.broadcast %167 : vector<1x128xf32> to vector<64x128xf32>
    %169 = arith.addf %166, %168 : vector<64x128xf32>
    %cst_65 = arith.constant dense<0xFF800000> : vector<64xf32>
    %170 = vector.multi_reduction <maximumf>, %169, %cst_65 [1] : vector<64x128xf32> to vector<64xf32>
    %171 = vector.shape_cast %170 : vector<64xf32> to vector<64x1xf32>
    %172 = vector.broadcast %171 : vector<64x1xf32> to vector<64x128xf32>
    %173 = arith.subf %169, %172 : vector<64x128xf32>
    %174 = math.exp %173 : vector<64x128xf32>
    %cst_66 = arith.constant dense<0.000000e+00> : vector<64xf32>
    %175 = vector.multi_reduction <add>, %174, %cst_66 [1] : vector<64x128xf32> to vector<64xf32>
    %176 = vector.shape_cast %175 : vector<64xf32> to vector<64x1xf32>
    %177 = math.log %176 : vector<64x1xf32>
    %178 = arith.addf %177, %171 : vector<64x1xf32>
    %179 = vector.broadcast %178 : vector<64x1xf32> to vector<64x128xf32>
    %180 = arith.subf %169, %179 : vector<64x128xf32>
    %c0_67 = arith.constant 0 : index
    %c0_68 = arith.constant 0 : index
    %181 = vector.load %arg9[%c0_67, %c0_68] : memref<64x128xf32, #tpu.memory_space<vmem>>, vector<64x128xf32>
    tpu.vector_store %arg9[%c0_67, %c0_68], %180 {strides = array<i32>} : memref<64x128xf32, #tpu.memory_space<vmem>>, vector<64x128xf32>,
    return
  }
  func.func @transform_0(%arg0: i32) -> (i32, i32) {
    %c0_i32 = arith.constant 0 : i32
    %c0_i32_0 = arith.constant 0 : i32
    %c0_i32_1 = arith.constant 0 : i32
    return %c0_i32, %c0_i32_0 : i32, i32
  }
  func.func @transform_1(%arg0: i32) -> (i32, i32) {
    %c0_i32 = arith.constant 0 : i32
    %c0_i32_0 = arith.constant 0 : i32
    %c0_i32_1 = arith.constant 0 : i32
    return %c0_i32, %c0_i32_0 : i32, i32
  }
  func.func @transform_2(%arg0: i32) -> (i32, i32) {
    %c0_i32 = arith.constant 0 : i32
    %c0_i32_0 = arith.constant 0 : i32
    %c0_i32_1 = arith.constant 0 : i32
    return %c0_i32, %c0_i32_0 : i32, i32
  }
  func.func @transform_3(%arg0: i32) -> (i32, i32) {
    %c0_i32 = arith.constant 0 : i32
    %c0_i32_0 = arith.constant 0 : i32
    %c0_i32_1 = arith.constant 0 : i32
    return %c0_i32, %c0_i32_0 : i32, i32
  }
  func.func @transform_4(%arg0: i32) -> (i32, i32) {
    %c0_i32 = arith.constant 0 : i32
    %c0_i32_0 = arith.constant 0 : i32
    %c0_i32_1 = arith.constant 0 : i32
    return %c0_i32, %c0_i32_0 : i32, i32
  }
  func.func @transform_5(%arg0: i32) -> (i32, i32) {
    %c0_i32 = arith.constant 0 : i32
    %c0_i32_0 = arith.constant 0 : i32
    %c0_i32_1 = arith.constant 0 : i32
    return %c0_i32, %c0_i32_0 : i32, i32
  }
  func.func @transform_6(%arg0: i32) -> (i32, i32) {
    %c0_i32 = arith.constant 0 : i32
    %c0_i32_0 = arith.constant 0 : i32
    %c0_i32_1 = arith.constant 0 : i32
    return %c0_i32, %c0_i32_0 : i32, i32
  }
  func.func @transform_7(%arg0: i32) -> (i32, i32) {
    %c0_i32 = arith.constant 0 : i32
    %c0_i32_0 = arith.constant 0 : i32
    %c0_i32_1 = arith.constant 0 : i32
    return %c0_i32, %c0_i32_0 : i32, i32
  }
  func.func @transform_8(%arg0: i32) -> (i32, i32) {
    %c0_i32 = arith.constant 0 : i32
    %c0_i32_0 = arith.constant 0 : i32
    %c0_i32_1 = arith.constant 0 : i32
    return %c0_i32, %c0_i32_0 : i32, i32
  }
  func.func @transform_9(%arg0: i32) -> (i32, i32) {
    %c0_i32 = arith.constant 0 : i32
    %c0_i32_0 = arith.constant 0 : i32
    %c0_i32_1 = arith.constant 0 : i32
    return %c0_i32, %c0_i32_0 : i32, i32
  }
  func.func @transform_10(%arg0: i32) -> (i32, i32) {
    %c0_i32 = arith.constant 0 : i32
    %c0_i32_0 = arith.constant 0 : i32
    %c0_i32_1 = arith.constant 0 : i32
    return %c0_i32, %c0_i32_0 : i32, i32
  }
}

</mosaic_0001>

<bundles_post_ra>
// kernel: tpu_custom_call.1
= control target key start
LH: loop header
LB: loop body
LE: loop exit
PB: predicated region body
PF: predicated region fallthrough
CT: control target
= control target key end

     0   :  { %16 = vsyncpa [#allocation5], 0  ;;  %s2179_s0 = inlined_call_operand.vmem [shape: f32[64,16], index: 0, kind: input, shape index: {}]   ;;  %s2180_s1 = inlined_call_operand.hbm [shape: f32[8,32], index: 1, kind: input, shape index: {}]   ;;  %s2181_s2 = inlined_call_operand.hbm [shape: f32[8,32], index: 2, kind: input, shape index: {}]   ;;  %s2182_s3 = inlined_call_operand.vmem [shape: f32[16,128], index: 3, kind: input, shape index: {}]   ;;  %s2183_s4 = inlined_call_operand.vmem [shape: f32[32,128], index: 4, kind: input, shape index: {}]   ;;  %s2184_s5 = inlined_call_operand.vmem [shape: f32[1,128], index: 5, kind: input, shape index: {}]   ;;  %s2185_s6 = inlined_call_operand.vmem [shape: f32[32,128], index: 6, kind: input, shape index: {}]   ;;  %s2186_s7 = inlined_call_operand.vmem [shape: f32[1,128], index: 7, kind: input, shape index: {}]   ;;  %s2187_s8 = inlined_call_operand.hbm [shape: f32[64,128], index: 8, kind: output, shape index: {0}]   ;;  %s2188_s9 = inlined_call_operand.hbm [shape: f32[8,32], index: 9, kind: output, shape index: {1}]   ;;  %s2189_s10 = inlined_call_operand.hbm [shape: f32[8,32], index: 10, kind: output, shape index: {2}]  }
   0x1   :  { %17 = vsyncpa [#allocation8], 0 }
   0x2   :  { %18 = vsyncpa [#allocation6], 0 }
   0x3   :  { %19 = vsyncpa [#allocation11], 0  ;;  %s1784_s13 = smov [#allocation4]   ;;  %s1785_s15 = smov [#allocation7]  }
   0x4   :  { %s28_s14 = sshll.u32 %s1784_s13, 4  ;;  %s38_s16 = sshll.u32 %s1785_s15, 4  ;;  %s29_s14 = int_to_ptr.vmem [resolvable:$true] %s28_s14  ;;  %s39_s16 = int_to_ptr.vmem [resolvable:$true] %s38_s16 }
   0x5   :  { %s1684_s17 = scalar_lea.vmem %s29_s14, 128  ;;  %p1689_p1 = scmp.lt.s32.totalorder %s29_s14, %s29_s14 }
   0x6   :  { %p1685_p0 = scmp.ne.s32.totalorder %s29_s14, %s1684_s17  ;;  %p1690_p2 = scmp.lt.s32.totalorder %s1684_s17, %s1684_s17 }
   0x8   :  { %p1691_p3 = por %p1690_p2, %p1689_p1 }
   0xa   :  { %p1692_p4 = pnand %p1691_p3, %p1685_p0 }
   0xc   :  { %1695 = shalt.err (!%p1692_p4)
}
   0xd   :  { %31 = dma.hbm_to_vmem [thread:$0]  %s2180_s1, 128, %s29_s14, [#allocation5]  }
   0xe   :  { %s1704_s20 = scalar_lea.vmem %s39_s16, 128  ;;  %p1709_p6 = scmp.lt.s32.totalorder %s39_s16, %s39_s16 }
   0xf   :  { %p1705_p5 = scmp.ne.s32.totalorder %s39_s16, %s1704_s20  ;;  %p1710_p7 = scmp.lt.s32.totalorder %s1704_s20, %s1704_s20 }
  0x11   :  { %p1711_p8 = por %p1710_p7, %p1709_p6 }
  0x13   :  { %p1712_p9 = pnand %p1711_p8, %p1705_p5 }
  0x15   :  { %1715 = shalt.err (!%p1712_p9)
}
  0x16   :  { %41 = dma.hbm_to_vmem [thread:$0]  %s2181_s2, 128, %s39_s16, [#allocation8]  }
  0x17   :  { %1776 = dma.done.wait [#allocation5], 128  }
  0x18   :  { %1777 = vsyncadd [#allocation5], 4294967168 }
  0x19   :  { %1778 = dma.done.wait [#allocation8], 128  }
  0x1a   :  { %1779 = vsyncadd [#allocation8], 4294967168  ;;  %vm75_vm0 = vcmask 130048   ;;  %v67_v0 = vld [vmem:[%s2182_s3 + $0x8] sm:$0xff]  ;;  %v66_v1 = vld [vmem:[%s2182_s3] sm:$0xff]  ;;  %v1786_v6 = vmov 0.0  }
  0x1b   :  { %v62_v2 = vld [vmem:[%s2179_s0 + $0x20] sm:$0xff]  ;;  %1564 = vmatprep.subr.mxu1 %v67_v0  ;;  %1440 = vmatprep.subr.mxu0 %v67_v0  ;;  %v63_v3 = vld [vmem:[%s2179_s0 + $0x28] sm:$0xff]  ;;  %v1873_v4 = vld [vmem:[%s2183_s4 + $0x18] sm:$0xff]  ;;  %vm1787_vm1 = vmmov 0   ;;  %vm220_vm2 = vcmask 261120   ;;  %s1788_s1 = smov 64  }
  0x1c   :  { %1566 = vmatpush3.msra.mxu1 %v67_v0  ;;  %1450 = vmatprep.mubr.msk.f32.mxu1 %vm75_vm0, %v62_v2  ;;  %v58_v5 = vld [vmem:[%s2179_s0] sm:$0xff]  ;;  %v59_v7 = vld [vmem:[%s2179_s0 + $0x8] sm:$0xff]  ;;  %v64_v8 = vld [vmem:[%s2179_s0 + $0x30] sm:$0xff]  ;;  %s1789_s25 = smov 32   ;;  %s1791_s15 = smov [#allocation10]  }
  0x1d   :  { %1565 = vmatprep.subr.mxu1 %v66_v1  ;;  %1441 = vmatpush3.msra.mxu0 %v67_v0  ;;  %v1890_v9 = vld [vmem:[%s2183_s4 + $0x10] sm:$0xff]  ;;  %v65_v10 = vld [vmem:[%s2179_s0 + $0x38] sm:$0xff]  ;;  %v1902_v11 = vld [vmem:[%s2183_s4 + $0x8] sm:$0xff]  ;;  %s1317_s16 = sshll.u32 %s1791_s15, 4  ;;  %s1318_s16 = int_to_ptr.vmem [resolvable:$true] %s1317_s16 }
  0x1e   :  { %1567 = vmatpush3.msra.mxu1 %v66_v1  ;;  %1442 = vmatprep.subr.mxu0 %v66_v1  ;;  %v1911_v12 = vld [vmem:[%s2183_s4] sm:$0xff]  ;;  %v218_v26 = vld [vmem:[#allocation7] sm:$0xff]  ;;  %v60_v55 = vld [vmem:[%s2179_s0 + $0x10] sm:$0xff]  ;;  %s1716_s17 = scalar_lea.vmem %s1318_s16, 128  ;;  %p1721_p11 = scmp.lt.s32.totalorder %s1318_s16, %s1318_s16 }
  0x1f   :  { %1451 = vmatmul.mubr.msk.f32.vlgmr.msra.gmra.mxu1 %vm75_vm0, %v63_v3  ;;  %1456 = vmatprep.subr.mxu1 %v1786_v6  ;;  %v217_v13 = vld [vmem:[#allocation4] sm:$0xff]  ;;  %v61_v56 = vld [vmem:[%s2179_s0 + $0x18] sm:$0xff]  ;;  %p1717_p10 = scmp.ne.s32.totalorder %s1318_s16, %s1716_s17  ;;  %p1722_p12 = scmp.lt.s32.totalorder %s1716_s17, %s1716_s17 }
  0x20   :  { %1457 = vmatpush3.msra.mxu1 %v1873_v4  ;;  %1443 = vmatpush3.msra.mxu0 %v66_v1  ;;  %v1947_v19 = vld [vmem:[%s2184_s5] ss:$0 sm:$0xff] }
  0x21   :  { %1444 = vmatprep.mubr.msk.f32.mxu0 %vm75_vm0, %v58_v5  ;;  %1458 = vmatprep.subr.mxu1 %v1786_v6  ;;  %p1723_p13 = por %p1722_p12, %p1721_p11 }
  0x22   :  { %1445 = vmatmul.mubr.msk.f32.vlgmr.msra.gmra.mxu0 %vm75_vm0, %v59_v7  ;;  %1453 = vmatprep.mubr.msk.f32.mxu1 %vm75_vm0, %v64_v8 }
  0x23   :  { %1459 = vmatpush3.msra.mxu1 %v1890_v9  ;;  %1478 = vmatprep.subr.mxu0 %v1786_v6  ;;  %p1724_p0 = pnand %p1723_p13, %p1717_p10 }
  0x24   :  { %1454 = vmatmul.mubr.msk.f32.gmra.mxu1 %vm75_vm0, %v65_v10  ;;  %1460 = vmatprep.subr.mxu1 %v1786_v6 }
  0x25   :  { %1461 = vmatpush3.msra.mxu1 %v1902_v11  ;;  %1464 = vmatprep.mubr.msk.f32.mxu1 %vm1787_vm1, %v1786_v6 }
  0x26   :  { %1462 = vmatprep.subr.mxu1 %v1786_v6  ;;  %1479 = vmatpush3.msra.mxu0 %v1873_v4 }
  0x27   :  { %1463 = vmatpush3.msra.mxu1 %v1911_v12  ;;  %1480 = vmatprep.subr.mxu0 %v1786_v6 }
  0x28   :  { %1465 = vmatmul.mubr.msk.f32.vlgmr.msra.gmra.mxu1 %vm220_vm2, %v217_v13  ;;  %1467 = vmatprep.subr.mxu1 %v1786_v6 }
  0x29   :  { %1468 = vmatpush3.msra.mxu1 %v1873_v4  ;;  %1475 = vmatprep.mubr.msk.f32.mxu1 %vm1787_vm1, %v1786_v6 }
  0x2a   :  { %1469 = vmatprep.subr.mxu1 %v1786_v6  ;;  %1481 = vmatpush3.msra.mxu0 %v1890_v9 }
  0x2b   :  { %1470 = vmatpush3.msra.mxu1 %v1890_v9  ;;  %1482 = vmatprep.subr.mxu0 %v1786_v6 }
  0x2c   :  { %1471 = vmatprep.subr.mxu1 %v1786_v6  ;;  %1483 = vmatpush3.msra.mxu0 %v1902_v11 }
  0x2d   :  { %1472 = vmatpush3.msra.mxu1 %v1902_v11  ;;  %1484 = vmatprep.subr.mxu0 %v1786_v6 }
  0x2e   :  { %1473 = vmatprep.subr.mxu1 %v1786_v6  ;;  %1485 = vmatpush3.msra.mxu0 %v1911_v12 }
  0x2f   :  { %1474 = vmatpush3.msra.mxu1 %v1911_v12  ;;  %1500 = vmatprep.subr.mxu0 %v1786_v6 }
  0x30   :  { %1489 = vmatprep.subr.mxu1 %v1786_v6  ;;  %1447 = vmatprep.mubr.msk.f32.mxu0 %vm75_vm0, %v60_v55 }
  0x31   :  { %1448 = vmatmul.mubr.msk.f32.gmra.mxu0 %vm75_vm0, %v61_v56 }
  0x32   :  { %1486 = vmatprep.mubr.msk.f32.mxu0 %vm1787_vm1, %v1786_v6 }
  0xdf   :  { %v1938_v14 = vpop.f32.mrf.mxu1 }
  0xe1   :  { %v1940_v15 = vpop.f32.mrf.mxu1 }
  0xe2   :  { %v1446_v16 = vpop.f32.mrf.mxu0 }
  0xe3   :  { %v172_v41 = vadd.f32 %v1446_v16, %v1947_v19 }
  0xe4   :  { %v1942_v17 = vpop.f32.mrf.mxu1  ;;  %v166_v18 = vpop.f32.mrf.mxu0 }
  0xe5   :  { %v167_v21 = vadd.f32 %v1947_v19, %v166_v18 }
  0xe6   :  { %v1949_v20 = vpop.f32.mrf.mxu1 }
  0xe8   :  { %v290_v22 = vpop.f32.mrf.mxu1 }
  0xe9   :  { %v294_v23 = vadd.f32 %v290_v22, %v167_v21 }
  0xea   :  { %v1466_v24 = vpop.f32.mrf.mxu1 }
  0xeb   :  { %1580 = vtanh.f32 %v294_v23  ;;  %v1354_v27 = vmul.f32 -1.442695, %v294_v23 }
  0xed   :  { %1582 = vpow2.f32 %v1354_v27 }
  0xf1   :  { %v1449_v61 = vpop.f32.mrf.mxu0 }
  0xf2   :  { %v182_v27 = vadd.f32 %v1449_v61, %v1947_v19 }
  0xf3   :  { %v176_v62 = vpop.f32.mrf.mxu0 }
  0xf4   :  { %v177_v63 = vadd.f32 %v1947_v19, %v176_v62  ;;  %v192_v62 = vadd.f32 %v1938_v14, %v1947_v19 }
  0xf8   :  { %v1581_v25 = vpop.eup %1580 }
  0xf9   :  { %308 = vrot.lane.b32.xlu0 %v1581_v25, %s1788_s1 }
  0xfa   :  { %v1583_v28 = vpop.eup %1582 }
  0xfb   :  { %v298_v29 = vadd.f32 1.0, %v1583_v28 }
  0xfd   :  { %303 = vrot.lane.b32.xlu0 %v218_v26, %s1789_s25  ;;  %1584 = vrcp.f32 %v298_v29 }
 0x10a   :  { %v1585_v30 = vpop.eup %1584 }
 0x16b   :  { %v309_v31 = vpop.permute.xlu0 %308 }
 0x16c   :  { %v311_v32 = vmul.f32 %v1585_v30, %v309_v31 }
 0x16e   :  { %313 = vrot.lane.b32.xlu1 %v311_v32, %s1789_s25 }
 0x16f   :  { %v304_v33 = vpop.permute.xlu0 %303 }
 0x170   :  { %v306_v34 = vmul.f32 %v1585_v30, %v304_v33 }
 0x1e0   :  { %v314_v35 = vpop.permute.xlu1 %313 }
 0x1e1   :  { %v316_v36 = vadd.f32 %v314_v35, %v306_v34 }
 0x1e3   :  { %1586 = vtanh.f32 %v316_v36 }
 0x1f0   :  { %v1587_v37 = vpop.eup %1586 }
 0x1f1   :  { %319 = vrot.lane.b32.xlu1 %v1587_v37, %s1788_s1 }
 0x263   :  { %v320_v38 = vpop.permute.xlu1 %319 }
 0x264   :  { %v322_v39 = vmul.f32 %v1585_v30, %v320_v38 }
 0x266   :  { %324 = vrot.lane.b32.xlu0 %v322_v39, %s1789_s25 }
 0x2d8   :  { %v325_v40 = vpop.permute.xlu0 %324 }
 0x2d9   :  { %327 = vst.msk [vmem:[#allocation3] sm:$0xff] %vm220_vm2, %v325_v40  ;;  %1476 = vmatmul.mubr.msk.f32.vlgmr.msra.gmra.mxu1 %vm220_vm2, %v325_v40 }
 0x2da   :  { %1490 = vmatpush3.msra.mxu1 %v1873_v4  ;;  %1497 = vmatprep.mubr.msk.f32.mxu1 %vm1787_vm1, %v1786_v6 }
 0x2db   :  { %1491 = vmatprep.subr.mxu1 %v1786_v6 }
 0x2dc   :  { %1492 = vmatpush3.msra.mxu1 %v1890_v9 }
 0x2dd   :  { %1493 = vmatprep.subr.mxu1 %v1786_v6 }
 0x2de   :  { %1494 = vmatpush3.msra.mxu1 %v1902_v11 }
 0x2df   :  { %1495 = vmatprep.subr.mxu1 %v1786_v6 }
 0x2e0   :  { %1496 = vmatpush3.msra.mxu1 %v1911_v12 }
 0x2e1   :  { %1511 = vmatprep.subr.mxu1 %v1786_v6 }
 0x399   :  { %v397_v42 = vpop.f32.mrf.mxu1 }
 0x39a   :  { %v401_v43 = vadd.f32 %v397_v42, %v172_v41 }
 0x39b   :  { %v1477_v44 = vpop.f32.mrf.mxu1 }
 0x39c   :  { %1588 = vtanh.f32 %v401_v43  ;;  %v1356_v46 = vmul.f32 -1.442695, %v401_v43 }
 0x39e   :  { %1590 = vpow2.f32 %v1356_v46 }
 0x3a9   :  { %v1589_v45 = vpop.eup %1588 }
 0x3aa   :  { %411 = vrot.lane.b32.xlu1 %v1589_v45, %s1788_s1  ;;  %v187_v45 = vadd.f32 %v1947_v19, %v1940_v15 }
 0x3ab   :  { %v1591_v47 = vpop.eup %1590 }
 0x3ac   :  { %v405_v48 = vadd.f32 1.0, %v1591_v47 }
 0x3ae   :  { %1592 = vrcp.f32 %v405_v48 }
 0x3bb   :  { %v1593_v49 = vpop.eup %1592 }
 0x3bc   :  { %v409_v52 = vmul.f32 %v1593_v49, %v316_v36 }
 0x41c   :  { %v412_v50 = vpop.permute.xlu1 %411 }
 0x41d   :  { %v414_v51 = vmul.f32 %v1593_v49, %v412_v50 }
 0x41f   :  { %416 = vrot.lane.b32.xlu0 %v414_v51, %s1789_s25 }
 0x491   :  { %v417_v53 = vpop.permute.xlu0 %416 }
 0x492   :  { %v419_v54 = vadd.f32 %v417_v53, %v409_v52 }
 0x494   :  { %1594 = vtanh.f32 %v419_v54 }
 0x4a1   :  { %v1595_v57 = vpop.eup %1594 }
 0x4a2   :  { %422 = vrot.lane.b32.xlu1 %v1595_v57, %s1788_s1 }
 0x514   :  { %v423_v58 = vpop.permute.xlu1 %422 }
 0x515   :  { %v425_v59 = vmul.f32 %v1593_v49, %v423_v58 }
 0x517   :  { %427 = vrot.lane.b32.xlu0 %v425_v59, %s1789_s25 }
 0x589   :  { %v428_v60 = vpop.permute.xlu0 %427 }
 0x58a   :  { %430 = vst.msk [vmem:[#allocation3 + $0x8] sm:$0xff] %vm220_vm2, %v428_v60  ;;  %1487 = vmatmul.mubr.msk.f32.vlgmr.msra.gmra.mxu0 %vm220_vm2, %v428_v60 }
 0x58b   :  { %1501 = vmatpush3.msra.mxu0 %v1873_v4  ;;  %1508 = vmatprep.mubr.msk.f32.mxu0 %vm1787_vm1, %v1786_v6 }
 0x58c   :  { %1502 = vmatprep.subr.mxu0 %v1786_v6 }
 0x58d   :  { %1503 = vmatpush3.msra.mxu0 %v1890_v9 }
 0x58e   :  { %1504 = vmatprep.subr.mxu0 %v1786_v6 }
 0x58f   :  { %1505 = vmatpush3.msra.mxu0 %v1902_v11 }
 0x590   :  { %1506 = vmatprep.subr.mxu0 %v1786_v6 }
 0x591   :  { %1507 = vmatpush3.msra.mxu0 %v1911_v12 }
 0x592   :  { %1522 = vmatprep.subr.mxu0 %v1786_v6 }
 0x64a   :  { %v500_v0 = vpop.f32.mrf.mxu0 }
 0x64b   :  { %v504_v1 = vadd.f32 %v500_v0, %v177_v63 }
 0x64c   :  { %v1488_v2 = vpop.f32.mrf.mxu0 }
 0x64d   :  { %1596 = vtanh.f32 %v504_v1  ;;  %v1358_v5 = vmul.f32 -1.442695, %v504_v1 }
 0x64f   :  { %1598 = vpow2.f32 %v1358_v5 }
 0x65a   :  { %v1597_v3 = vpop.eup %1596 }
 0x65b   :  { %514 = vrot.lane.b32.xlu1 %v1597_v3, %s1788_s1 }
 0x65c   :  { %v1599_v7 = vpop.eup %1598 }
 0x65d   :  { %v508_v8 = vadd.f32 1.0, %v1599_v7 }
 0x65f   :  { %1600 = vrcp.f32 %v508_v8  ;;  %v1066_v8 = vld [vmem:[%s2185_s6 + $0x18] sm:$0xff] }
 0x66c   :  { %v1601_v10 = vpop.eup %1600 }
 0x66d   :  { %v512_v18 = vmul.f32 %v1601_v10, %v419_v54 }
 0x6cd   :  { %v515_v13 = vpop.permute.xlu1 %514 }
 0x6ce   :  { %v517_v16 = vmul.f32 %v1601_v10, %v515_v13 }
 0x6d0   :  { %519 = vrot.lane.b32.xlu0 %v517_v16, %s1789_s25 }
 0x742   :  { %v520_v21 = vpop.permute.xlu0 %519 }
 0x743   :  { %v522_v22 = vadd.f32 %v520_v21, %v512_v18  ;;  %v1065_v21 = vld [vmem:[%s2185_s6 + $0x10] sm:$0xff] }
 0x745   :  { %1602 = vtanh.f32 %v522_v22 }
 0x752   :  { %v1603_v23 = vpop.eup %1602 }
 0x753   :  { %525 = vrot.lane.b32.xlu1 %v1603_v23, %s1788_s1  ;;  %v1064_v23 = vld [vmem:[%s2185_s6 + $0x8] sm:$0xff] }
 0x7c5   :  { %v526_v24 = vpop.permute.xlu1 %525 }
 0x7c6   :  { %v528_v25 = vmul.f32 %v1601_v10, %v526_v24  ;;  %v1063_v24 = vld [vmem:[%s2185_s6] sm:$0xff] }
 0x7c8   :  { %530 = vrot.lane.b32.xlu0 %v528_v25, %s1789_s25  ;;  %v1056_v25 = vld [vmem:[#allocation3 + $0x8] sm:$0xff] }
 0x83a   :  { %v531_v26 = vpop.permute.xlu0 %530 }
 0x83b   :  { %533 = vst.msk [vmem:[#allocation3 + $0x10] sm:$0xff] %vm220_vm2, %v531_v26  ;;  %1498 = vmatmul.mubr.msk.f32.vlgmr.msra.gmra.mxu1 %vm220_vm2, %v531_v26 }
 0x83c   :  { %1512 = vmatpush3.msra.mxu1 %v1873_v4  ;;  %1519 = vmatprep.mubr.msk.f32.mxu1 %vm1787_vm1, %v1786_v6 }
 0x83d   :  { %1513 = vmatprep.subr.mxu1 %v1786_v6 }
 0x83e   :  { %1514 = vmatpush3.msra.mxu1 %v1890_v9 }
 0x83f   :  { %1515 = vmatprep.subr.mxu1 %v1786_v6 }
 0x840   :  { %1516 = vmatpush3.msra.mxu1 %v1902_v11 }
 0x841   :  { %1517 = vmatprep.subr.mxu1 %v1786_v6 }
 0x842   :  { %1518 = vmatpush3.msra.mxu1 %v1911_v12  ;;  %v1057_v26 = vld [vmem:[#allocation3 + $0x10] sm:$0xff] }
 0x843   :  { %1533 = vmatprep.subr.mxu1 %v1786_v6 }
 0x8fb   :  { %v603_v28 = vpop.f32.mrf.mxu1 }
 0x8fc   :  { %v607_v29 = vadd.f32 %v603_v28, %v182_v27 }
 0x8fd   :  { %v1499_v30 = vpop.f32.mrf.mxu1 }
 0x8fe   :  { %1604 = vtanh.f32 %v607_v29  ;;  %v1360_v32 = vmul.f32 -1.442695, %v607_v29  ;;  %v197_v30 = vadd.f32 %v1947_v19, %v1949_v20 }
 0x900   :  { %1606 = vpow2.f32 %v1360_v32 }
 0x90b   :  { %v1605_v31 = vpop.eup %1604 }
 0x90c   :  { %617 = vrot.lane.b32.xlu1 %v1605_v31, %s1788_s1 }
 0x90d   :  { %v1607_v33 = vpop.eup %1606 }
 0x90e   :  { %v611_v34 = vadd.f32 1.0, %v1607_v33 }
 0x910   :  { %1608 = vrcp.f32 %v611_v34 }
 0x91d   :  { %v1609_v35 = vpop.eup %1608 }
 0x91e   :  { %v615_v38 = vmul.f32 %v1609_v35, %v522_v22  ;;  %v1055_v22 = vld [vmem:[#allocation3] sm:$0xff] }
 0x97e   :  { %v618_v36 = vpop.permute.xlu1 %617 }
 0x97f   :  { %v620_v37 = vmul.f32 %v1609_v35, %v618_v36 }
 0x981   :  { %622 = vrot.lane.b32.xlu0 %v620_v37, %s1789_s25 }
 0x9f3   :  { %v623_v39 = vpop.permute.xlu0 %622 }
 0x9f4   :  { %v625_v40 = vadd.f32 %v623_v39, %v615_v38 }
 0x9f6   :  { %1610 = vtanh.f32 %v625_v40 }
 0xa03   :  { %v1611_v41 = vpop.eup %1610 }
 0xa04   :  { %628 = vrot.lane.b32.xlu1 %v1611_v41, %s1788_s1 }
 0xa76   :  { %v629_v42 = vpop.permute.xlu1 %628 }
 0xa77   :  { %v631_v43 = vmul.f32 %v1609_v35, %v629_v42 }
 0xa79   :  { %633 = vrot.lane.b32.xlu0 %v631_v43, %s1789_s25 }
 0xaeb   :  { %v634_v44 = vpop.permute.xlu0 %633 }
 0xaec   :  { %636 = vst.msk [vmem:[#allocation3 + $0x18] sm:$0xff] %vm220_vm2, %v634_v44  ;;  %1509 = vmatmul.mubr.msk.f32.vlgmr.msra.gmra.mxu0 %vm220_vm2, %v634_v44 }
 0xaed   :  { %1523 = vmatpush3.msra.mxu0 %v1873_v4  ;;  %1530 = vmatprep.mubr.msk.f32.mxu0 %vm1787_vm1, %v1786_v6 }
 0xaee   :  { %1524 = vmatprep.subr.mxu0 %v1786_v6 }
 0xaef   :  { %1525 = vmatpush3.msra.mxu0 %v1890_v9 }
 0xaf0   :  { %1526 = vmatprep.subr.mxu0 %v1786_v6 }
 0xaf1   :  { %1527 = vmatpush3.msra.mxu0 %v1902_v11 }
 0xaf2   :  { %1528 = vmatprep.subr.mxu0 %v1786_v6 }
 0xaf3   :  { %1529 = vmatpush3.msra.mxu0 %v1911_v12  ;;  %v1058_v27 = vld [vmem:[#allocation3 + $0x18] sm:$0xff] }
 0xaf4   :  { %1544 = vmatprep.subr.mxu0 %v1066_v8 }
 0xbac   :  { %v706_v46 = vpop.f32.mrf.mxu0 }
 0xbad   :  { %v710_v47 = vadd.f32 %v706_v46, %v187_v45 }
 0xbae   :  { %v1510_v48 = vpop.f32.mrf.mxu0 }
 0xbaf   :  { %1612 = vtanh.f32 %v710_v47  ;;  %v1362_v50 = vmul.f32 -1.442695, %v710_v47  ;;  %v202_v48 = vadd.f32 %v1942_v17, %v1947_v19 }
 0xbb1   :  { %1614 = vpow2.f32 %v1362_v50 }
 0xbbc   :  { %v1613_v49 = vpop.eup %1612 }
 0xbbd   :  { %720 = vrot.lane.b32.xlu1 %v1613_v49, %s1788_s1 }
 0xbbe   :  { %v1615_v51 = vpop.eup %1614 }
 0xbbf   :  { %v714_v52 = vadd.f32 1.0, %v1615_v51 }
 0xbc1   :  { %1616 = vrcp.f32 %v714_v52 }
 0xbce   :  { %v1617_v53 = vpop.eup %1616 }
 0xbcf   :  { %v718_v56 = vmul.f32 %v1617_v53, %v625_v40 }
 0xc2f   :  { %v721_v54 = vpop.permute.xlu1 %720 }
 0xc30   :  { %v723_v55 = vmul.f32 %v1617_v53, %v721_v54 }
 0xc32   :  { %725 = vrot.lane.b32.xlu0 %v723_v55, %s1789_s25 }
 0xca4   :  { %v726_v57 = vpop.permute.xlu0 %725 }
 0xca5   :  { %v728_v15 = vadd.f32 %v726_v57, %v718_v56 }
 0xca7   :  { %1618 = vtanh.f32 %v728_v15 }
 0xcb4   :  { %v1619_v58 = vpop.eup %1618 }
 0xcb5   :  { %731 = vrot.lane.b32.xlu1 %v1619_v58, %s1788_s1 }
 0xd27   :  { %v732_v59 = vpop.permute.xlu1 %731 }
 0xd28   :  { %v734_v60 = vmul.f32 %v1617_v53, %v732_v59 }
 0xd2a   :  { %736 = vrot.lane.b32.xlu0 %v734_v60, %s1789_s25 }
 0xd9c   :  { %v737_v61 = vpop.permute.xlu0 %736 }
 0xd9d   :  { %739 = vst.msk [vmem:[#allocation3 + $0x20] sm:$0xff] %vm220_vm2, %v737_v61  ;;  %1520 = vmatmul.mubr.msk.f32.vlgmr.msra.gmra.mxu1 %vm220_vm2, %v737_v61 }
 0xd9e   :  { %1534 = vmatpush3.msra.mxu1 %v1873_v4  ;;  %1541 = vmatprep.mubr.msk.f32.mxu1 %vm1787_vm1, %v1786_v6 }
 0xd9f   :  { %1535 = vmatprep.subr.mxu1 %v1786_v6 }
 0xda0   :  { %1536 = vmatpush3.msra.mxu1 %v1890_v9 }
 0xda1   :  { %1537 = vmatprep.subr.mxu1 %v1786_v6 }
 0xda2   :  { %1538 = vmatpush3.msra.mxu1 %v1902_v11 }
 0xda3   :  { %1539 = vmatprep.subr.mxu1 %v1786_v6 }
 0xda4   :  { %1540 = vmatpush3.msra.mxu1 %v1911_v12  ;;  %v1059_v28 = vld [vmem:[#allocation3 + $0x20] sm:$0xff] }
 0xe5d   :  { %v809_v63 = vpop.f32.mrf.mxu1 }
 0xe5e   :  { %v813_v4 = vadd.f32 %v809_v63, %v192_v62  ;;  %v1369_v63 = vld [vmem:[%s2186_s7] ss:$0 sm:$0xff]  ;;  %s1790_s7 = smov 96  }
 0xe5f   :  { %v1521_v0 = vpop.f32.mrf.mxu1 }
 0xe60   :  { %1620 = vtanh.f32 %v813_v4  ;;  %v1364_v2 = vmul.f32 -1.442695, %v813_v4 }
 0xe62   :  { %1622 = vpow2.f32 %v1364_v2 }
 0xe6d   :  { %v1621_v1 = vpop.eup %1620 }
 0xe6e   :  { %823 = vrot.lane.b32.xlu1 %v1621_v1, %s1788_s1 }
 0xe6f   :  { %v1623_v9 = vpop.eup %1622 }
 0xe70   :  { %v817_v3 = vadd.f32 1.0, %v1623_v9 }
 0xe72   :  { %1624 = vrcp.f32 %v817_v3 }
 0xe7f   :  { %v1625_v11 = vpop.eup %1624 }
 0xe80   :  { %v821_v12 = vmul.f32 %v1625_v11, %v728_v15 }
 0xee0   :  { %v824_v5 = vpop.permute.xlu1 %823 }
 0xee1   :  { %v826_v6 = vmul.f32 %v1625_v11, %v824_v5 }
 0xee3   :  { %828 = vrot.lane.b32.xlu0 %v826_v6, %s1789_s25 }
 0xf55   :  { %v829_v7 = vpop.permute.xlu0 %828 }
 0xf56   :  { %v831_v14 = vadd.f32 %v829_v7, %v821_v12 }
 0xf58   :  { %1626 = vtanh.f32 %v831_v14 }
 0xf65   :  { %v1627_v10 = vpop.eup %1626 }
 0xf66   :  { %834 = vrot.lane.b32.xlu1 %v1627_v10, %s1788_s1 }
 0xfd8   :  { %v835_v13 = vpop.permute.xlu1 %834 }
 0xfd9   :  { %v837_v16 = vmul.f32 %v1625_v11, %v835_v13 }
 0xfdb   :  { %839 = vrot.lane.b32.xlu0 %v837_v16, %s1789_s25 }
0x104d   :  { %v840_v18 = vpop.permute.xlu0 %839 }
0x104e   :  { %842 = vst.msk [vmem:[#allocation3 + $0x28] sm:$0xff] %vm220_vm2, %v840_v18  ;;  %1531 = vmatmul.mubr.msk.f32.vlgmr.msra.gmra.mxu0 %vm220_vm2, %v840_v18 }
0x104f   :  { %1545 = vmatpush3.msra.mxu0 %v1066_v8  ;;  %1552 = vmatprep.mubr.msk.f32.mxu0 %vm220_vm2, %v1055_v22 }
0x1050   :  { %1546 = vmatprep.subr.mxu0 %v1065_v21 }
0x1051   :  { %1547 = vmatpush3.msra.mxu0 %v1065_v21 }
0x1052   :  { %1548 = vmatprep.subr.mxu0 %v1064_v23 }
0x1053   :  { %1549 = vmatpush3.msra.mxu0 %v1064_v23 }
0x1054   :  { %1550 = vmatprep.subr.mxu0 %v1063_v24 }
0x1055   :  { %1551 = vmatpush3.msra.mxu0 %v1063_v24  ;;  %v1060_v29 = vld [vmem:[#allocation3 + $0x28] sm:$0xff] }
0x1056   :  { %1553 = vmatmul.mubr.msk.f32.vlgmr.msra.gmra.mxu0 %vm220_vm2, %v1056_v25 }
0x1057   :  { %1555 = vmatprep.mubr.msk.f32.mxu0 %vm220_vm2, %v1057_v26 }
0x105a   :  { %1556 = vmatmul.mubr.msk.f32.gmra.mxu0 %vm220_vm2, %v1058_v27 }
0x105b   :  { %1558 = vmatprep.mubr.msk.f32.mxu0 %vm220_vm2, %v1059_v28 }
0x105e   :  { %1559 = vmatmul.mubr.msk.f32.gmra.mxu0 %vm220_vm2, %v1060_v29 }
0x110e   :  { %v912_v31 = vpop.f32.mrf.mxu0 }
0x110f   :  { %v916_v32 = vadd.f32 %v912_v31, %v197_v30 }
0x1110   :  { %v1532_v33 = vpop.f32.mrf.mxu0 }
0x1111   :  { %1628 = vtanh.f32 %v916_v32  ;;  %v1366_v35 = vmul.f32 -1.442695, %v916_v32 }
0x1113   :  { %1630 = vpow2.f32 %v1366_v35 }
0x1116   :  { %v1554_v60 = vpop.f32.mrf.mxu0 }
0x1117   :  { %v2102_v5 = vadd.f32 %v1554_v60, %v1369_v63 }
0x1118   :  { %v1164_v61 = vpop.f32.mrf.mxu0 }
0x1119   :  { %v2092_v4 = vadd.f32 %v1369_v63, %v1164_v61 }
0x111a   :  { %v1557_v62 = vpop.f32.mrf.mxu0 }
0x111b   :  { %v2095_v1 = vadd.f32 %v1557_v62, %v1369_v63 }
0x111c   :  { %v1174_v0 = vpop.f32.mrf.mxu0 }
0x111d   :  { %v2105_v6 = vadd.f32 %v1369_v63, %v1174_v0 }
0x111e   :  { %v1629_v34 = vpop.eup %1628  ;;  %v1560_v2 = vpop.f32.mrf.mxu0 }
0x111f   :  { %926 = vrot.lane.b32.xlu1 %v1629_v34, %s1788_s1  ;;  %v2098_v9 = vadd.f32 %v1560_v2, %v1369_v63 }
0x1120   :  { %v1631_v36 = vpop.eup %1630  ;;  %v1184_v12 = vpop.f32.mrf.mxu0 }
0x1121   :  { %v920_v37 = vadd.f32 1.0, %v1631_v36  ;;  %v2108_v7 = vadd.f32 %v1369_v63, %v1184_v12 }
0x1123   :  { %1632 = vrcp.f32 %v920_v37 }
0x1130   :  { %v1633_v38 = vpop.eup %1632 }
0x1131   :  { %v924_v41 = vmul.f32 %v1633_v38, %v831_v14 }
0x1191   :  { %v927_v39 = vpop.permute.xlu1 %926 }
0x1192   :  { %v929_v40 = vmul.f32 %v1633_v38, %v927_v39 }
0x1194   :  { %931 = vrot.lane.b32.xlu0 %v929_v40, %s1789_s25 }
0x1206   :  { %v932_v42 = vpop.permute.xlu0 %931 }
0x1207   :  { %v934_v20 = vadd.f32 %v932_v42, %v924_v41 }
0x1209   :  { %1634 = vtanh.f32 %v934_v20 }
0x1216   :  { %v1635_v43 = vpop.eup %1634 }
0x1217   :  { %937 = vrot.lane.b32.xlu1 %v1635_v43, %s1788_s1 }
0x1289   :  { %v938_v44 = vpop.permute.xlu1 %937 }
0x128a   :  { %v940_v45 = vmul.f32 %v1633_v38, %v938_v44 }
0x128c   :  { %942 = vrot.lane.b32.xlu0 %v940_v45, %s1789_s25 }
0x12fe   :  { %v943_v46 = vpop.permute.xlu0 %942 }
0x12ff   :  { %945 = vst.msk [vmem:[#allocation3 + $0x30] sm:$0xff] %vm220_vm2, %v943_v46  ;;  %1542 = vmatmul.mubr.msk.f32.vlgmr.msra.gmra.mxu1 %vm220_vm2, %v943_v46 }
0x1306   :  { %v1061_v47 = vld [vmem:[#allocation3 + $0x30] sm:$0xff] }
0x1307   :  { %1561 = vmatprep.mubr.msk.f32.mxu0 %vm220_vm2, %v1061_v47 }
0x13bf   :  { %v1015_v49 = vpop.f32.mrf.mxu1 }
0x13c0   :  { %v1019_v50 = vadd.f32 %v1015_v49, %v202_v48 }
0x13c1   :  { %v1543_v51 = vpop.f32.mrf.mxu1 }
0x13c2   :  { %1636 = vtanh.f32 %v1019_v50  ;;  %v1368_v53 = vmul.f32 -1.442695, %v1019_v50 }
0x13c4   :  { %1638 = vpow2.f32 %v1368_v53 }
0x13cf   :  { %v1637_v52 = vpop.eup %1636 }
0x13d0   :  { %1029 = vrot.lane.b32.xlu1 %v1637_v52, %s1788_s1 }
0x13d1   :  { %v1639_v54 = vpop.eup %1638 }
0x13d2   :  { %v1023_v55 = vadd.f32 1.0, %v1639_v54 }
0x13d4   :  { %1640 = vrcp.f32 %v1023_v55 }
0x13e1   :  { %v1641_v56 = vpop.eup %1640 }
0x13e2   :  { %v1027_v58 = vmul.f32 %v1641_v56, %v934_v20 }
0x1442   :  { %v1030_v57 = vpop.permute.xlu1 %1029 }
0x1443   :  { %v1032_v15 = vmul.f32 %v1641_v56, %v1030_v57 }
0x1445   :  { %1034 = vrot.lane.b32.xlu0 %v1032_v15, %s1789_s25 }
0x14b7   :  { %v1035_v59 = vpop.permute.xlu0 %1034 }
0x14b8   :  { %v2085_v17 = vadd.f32 %v1035_v59, %v1027_v58 }
0x14ba   :  { %1642 = vtanh.f32 %v2085_v17 }
0x14c7   :  { %v1643_v19 = vpop.eup %1642 }
0x14c8   :  { %1040 = vrot.lane.b32.xlu1 %v1643_v19, %s1788_s1 }
0x14ec   :  { %1203 = vmax.xlane.f32.xlu1 %v2092_v4 }
0x14f0   :  { %1209 = vmax.xlane.f32.xlu1 %v2095_v1 }
0x14f4   :  { %1213 = vmax.xlane.f32.xlu1 %v2098_v9 }
0x153a   :  { %v1041_v3 = vpop.permute.xlu1 %1040 }
0x153b   :  { %v1043_v11 = vmul.f32 %v1641_v56, %v1041_v3 }
0x153d   :  { %1045 = vrot.lane.b32.xlu0 %v1043_v11, %s1789_s25 }
0x155c   :  { %1205 = vmax.xlane.f32.xlu0 %v2102_v5 }
0x1560   :  { %1207 = vmax.xlane.f32.xlu0 %v2105_v6 }
0x1564   :  { %1211 = vmax.xlane.f32.xlu0 %v2108_v7 }
0x1575   :  { %v2114_v10 = vpop.xlane.xlu1 %1203 }
0x1576   :  { %v1219_v22 = vsub.f32 %v2092_v4, %v2114_v10 }
0x1578   :  { %v1227_v26 = vmul.f32 1.442695, %v1219_v22 }
0x1579   :  { %v2118_v16 = vpop.xlane.xlu1 %1209 }
0x157a   :  { %v1222_v23 = vsub.f32 %v2095_v1, %v2118_v16 }
0x157c   :  { %v1233_v29 = vmul.f32 1.442695, %v1222_v23 }
0x157d   :  { %v2128_v25 = vpop.xlane.xlu1 %1213 }
0x157e   :  { %v1224_v30 = vsub.f32 %v2098_v9, %v2128_v25 }
0x1580   :  { %v1237_v33 = vmul.f32 1.442695, %v1224_v30 }
0x15af   :  { %v1046_v14 = vpop.permute.xlu0 %1045 }
0x15b0   :  { %1048 = vst.msk [vmem:[#allocation3 + $0x38] sm:$0xff] %vm220_vm2, %v1046_v14  ;;  %1049 = vst.msk [vmem:[#allocation10] sm:$0xff] %vm220_vm2, %v1046_v14 }
0x15b7   :  { %v1062_v8 = vld [vmem:[#allocation3 + $0x38] sm:$0xff] }
0x15b8   :  { %1562 = vmatmul.mubr.msk.f32.gmra.mxu0 %vm220_vm2, %v1062_v8 }
0x15e5   :  { %v2116_v13 = vpop.xlane.xlu0 %1205 }
0x15e6   :  { %v1220_v18 = vsub.f32 %v2102_v5, %v2116_v13 }
0x15e8   :  { %v1229_v24 = vmul.f32 1.442695, %v1220_v18 }
0x15e9   :  { %v2122_v21 = vpop.xlane.xlu0 %1207 }
0x15ea   :  { %v1221_v27 = vsub.f32 %v2105_v6, %v2122_v21  ;;  %1644 = vpow2.f32 %v1229_v24 }
0x15eb   :  { %1646 = vpow2.f32 %v1227_v26 }
0x15ec   :  { %v1231_v31 = vmul.f32 1.442695, %v1221_v27  ;;  %1648 = vpow2.f32 %v1233_v29 }
0x15ed   :  { %v2132_v28 = vpop.xlane.xlu0 %1211 }
0x15ee   :  { %v1223_v32 = vsub.f32 %v2108_v7, %v2132_v28  ;;  %1650 = vpow2.f32 %v1231_v31 }
0x15ef   :  { %1652 = vpow2.f32 %v1237_v33 }
0x15f0   :  { %v1235_v34 = vmul.f32 1.442695, %v1223_v32 }
0x15f2   :  { %1654 = vpow2.f32 %v1235_v34 }
0x15f7   :  { %v1645_v39 = vpop.eup %1644 }
0x15f8   :  { %v1647_v40 = vpop.eup %1646 }
0x15f9   :  { %v1649_v41 = vpop.eup %1648 }
0x15fb   :  { %v1651_v42 = vpop.eup %1650 }
0x15fc   :  { %v1653_v20 = vpop.eup %1652 }
0x15ff   :  { %v1655_v43 = vpop.eup %1654 }
0x1678   :  { %v1563_v35 = vpop.f32.mrf.mxu0 }
0x1679   :  { %v2138_v36 = vadd.f32 %v1563_v35, %v1369_v63 }
0x167a   :  { %v1194_v37 = vpop.f32.mrf.mxu0 }
0x167b   :  { %v2140_v38 = vadd.f32 %v1369_v63, %v1194_v37  ;;  %1217 = vmax.xlane.f32.xlu1 %v2138_v36 }
0x167d   :  { %1215 = vmax.xlane.f32.xlu0 %v2140_v38 }
0x167f   :  { %1245 = vadd.xlane.f32.xlu1 %v1645_v39 }
0x1681   :  { %1243 = vadd.xlane.f32.xlu0 %v1647_v40 }
0x1683   :  { %1249 = vadd.xlane.f32.xlu1 %v1649_v41 }
0x1685   :  { %1247 = vadd.xlane.f32.xlu0 %v1651_v42 }
0x1687   :  { %1253 = vadd.xlane.f32.xlu1 %v1653_v20 }
0x1689   :  { %1251 = vadd.xlane.f32.xlu0 %v1655_v43 }
0x1704   :  { %v2144_v44 = vpop.xlane.xlu1 %1217 }
0x1705   :  { %v1226_v45 = vsub.f32 %v2138_v36, %v2144_v44 }
0x1706   :  { %v2148_v46 = vpop.xlane.xlu0 %1215 }
0x1707   :  { %v1241_v47 = vmul.f32 1.442695, %v1226_v45  ;;  %v1225_v48 = vsub.f32 %v2140_v38, %v2148_v46 }
0x1708   :  { %v1246_v49 = vpop.xlane.xlu1 %1245 }
0x1709   :  { %1656 = vpow2.f32 %v1241_v47  ;;  %v1239_v50 = vmul.f32 1.442695, %v1225_v48 }
0x170a   :  { %1658 = vlog2.f32 %v1246_v49  ;;  %v1244_v51 = vpop.xlane.xlu0 %1243 }
0x170b   :  { %1660 = vpow2.f32 %v1239_v50 }
0x170c   :  { %1662 = vlog2.f32 %v1244_v51  ;;  %v1250_v52 = vpop.xlane.xlu1 %1249 }
0x170d   :  { %1664 = vlog2.f32 %v1250_v52 }
0x170e   :  { %v1248_v53 = vpop.xlane.xlu0 %1247 }
0x170f   :  { %1666 = vlog2.f32 %v1248_v53 }
0x1710   :  { %v1254_v54 = vpop.xlane.xlu1 %1253 }
0x1711   :  { %1668 = vlog2.f32 %v1254_v54 }
0x1712   :  { %v1252_v55 = vpop.xlane.xlu0 %1251 }
0x1713   :  { %1670 = vlog2.f32 %v1252_v55 }
0x1716   :  { %v1657_v56 = vpop.eup %1656 }
0x1717   :  { %v1659_v57 = vpop.eup %1658  ;;  %1257 = vadd.xlane.f32.xlu1 %v1657_v56 }
0x1718   :  { %v1661_v15 = vpop.eup %1660  ;;  %v1262_v58 = vmul.f32 0.6931472, %v1659_v57 }
0x1719   :  { %v1663_v59 = vpop.eup %1662  ;;  %1255 = vadd.xlane.f32.xlu0 %v1661_v15 }
0x171a   :  { %v1665_v19 = vpop.eup %1664  ;;  %v1276_v60 = vadd.f32 %v1262_v58, %v2116_v13  ;;  %v1260_v61 = vmul.f32 0.6931472, %v1663_v59 }
0x171b   :  { %v1266_v62 = vmul.f32 0.6931472, %v1665_v19 }
0x171c   :  { %v1667_v63 = vpop.eup %1666  ;;  %v1284_v0 = vsub.f32 %v2102_v5, %v1276_v60  ;;  %v1275_v2 = vadd.f32 %v1260_v61, %v2114_v10 }
0x171d   :  { %v1278_v3 = vadd.f32 %v1266_v62, %v2118_v16  ;;  %v1264_v11 = vmul.f32 0.6931472, %v1667_v63 }
0x171e   :  { %v1669_v12 = vpop.eup %1668  ;;  %1292 = vst [vmem:[#allocation9 + $0x8] sm:$0xff] %v1284_v0  ;;  %v1283_v14 = vsub.f32 %v2092_v4, %v1275_v2 }
0x171f   :  { %v1286_v8 = vsub.f32 %v2095_v1, %v1278_v3  ;;  %v1277_v18 = vadd.f32 %v1264_v11, %v2122_v21  ;;  %v1270_v22 = vmul.f32 0.6931472, %v1669_v12 }
0x1720   :  { %v1671_v13 = vpop.eup %1670  ;;  %1291 = vst [vmem:[#allocation9] sm:$0xff] %v1283_v14 }
0x1721   :  { %1294 = vst [vmem:[#allocation9 + $0x18] sm:$0xff] %v1286_v8  ;;  %v1285_v23 = vsub.f32 %v2105_v6, %v1277_v18  ;;  %v1280_v5 = vadd.f32 %v1270_v22, %v2128_v25  ;;  %v1268_v10 = vmul.f32 0.6931472, %v1671_v13 }
0x1723   :  { %1293 = vst [vmem:[#allocation9 + $0x10] sm:$0xff] %v1285_v23  ;;  %v1288_v16 = vsub.f32 %v2098_v9, %v1280_v5  ;;  %v1279_v24 = vadd.f32 %v1268_v10, %v2132_v28 }
0x1725   :  { %1296 = vst [vmem:[#allocation9 + $0x28] sm:$0xff] %v1288_v16  ;;  %v1287_v4 = vsub.f32 %v2108_v7, %v1279_v24 }
0x1727   :  { %1295 = vst [vmem:[#allocation9 + $0x20] sm:$0xff] %v1287_v4 }
0x172f   :  { %1051 = vrot.lane.b32.xlu0 %v2085_v17, %s1790_s7 }
0x1730   :  { %1727 = shalt.err (!%p1724_p0)
}
0x1731   :  { %1320 = dma.vmem_to_hbm [thread:$0]  %s1318_s16, 128, %s2188_s9, [#allocation11]  }
0x1732   :  { %s1792_s20 = smov [#allocation12]  }
0x1733   :  { %s1327_s21 = sshll.u32 %s1792_s20, 4  ;;  %s1328_s21 = int_to_ptr.vmem [resolvable:$true] %s1327_s21 }
0x1734   :  { %s1736_s22 = scalar_lea.vmem %s1328_s21, 128  ;;  %p1741_p2 = scmp.lt.s32.totalorder %s1328_s21, %s1328_s21 }
0x1735   :  { %p1737_p1 = scmp.ne.s32.totalorder %s1328_s21, %s1736_s22  ;;  %p1742_p3 = scmp.lt.s32.totalorder %s1736_s22, %s1736_s22 }
0x1737   :  { %p1743_p4 = por %p1742_p3, %p1741_p2 }
0x1739   :  { %p1744_p5 = pnand %p1743_p4, %p1737_p1 }
0x17a0   :  { %v1258_v1 = vpop.xlane.xlu1 %1257 }
0x17a1   :  { %1672 = vlog2.f32 %v1258_v1 }
0x17a2   :  { %v1256_v9 = vpop.xlane.xlu0 %1255 }
0x17a3   :  { %1674 = vlog2.f32 %v1256_v9 }
0x17a6   :  { %v1052_v17 = vpop.permute.xlu0 %1051 }
0x17a7   :  { %1054 = vst.msk [vmem:[#allocation12] sm:$0xff] %vm220_vm2, %v1052_v17 }
0x17a8   :  { %1747 = shalt.err (!%p1744_p5)
}
0x17a9   :  { %1330 = dma.vmem_to_hbm [thread:$0]  %s1328_s21, 128, %s2189_s10, [#allocation11]  }
0x17aa   :  { %s1793_s9 = smov [#allocation9]  }
0x17ab   :  { %s1304_s24 = sshll.u32 %s1793_s9, 4  ;;  %s1305_s24 = int_to_ptr.vmem [resolvable:$true] %s1304_s24 }
0x17ac   :  { %s1756_s1 = scalar_lea.vmem %s1305_s24, 1024  ;;  %p1761_p7 = scmp.lt.s32.totalorder %s1305_s24, %s1305_s24 }
0x17ad   :  { %p1757_p6 = scmp.ne.s32.totalorder %s1305_s24, %s1756_s1  ;;  %p1762_p8 = scmp.lt.s32.totalorder %s1756_s1, %s1756_s1 }
0x17ae   :  { %v1673_v6 = vpop.eup %1672 }
0x17af   :  { %v1274_v7 = vmul.f32 0.6931472, %v1673_v6  ;;  %p1763_p9 = por %p1762_p8, %p1761_p7 }
0x17b0   :  { %v1675_v21 = vpop.eup %1674 }
0x17b1   :  { %v1282_v25 = vadd.f32 %v1274_v7, %v2144_v44  ;;  %v1272_v26 = vmul.f32 0.6931472, %v1675_v21  ;;  %p1764_p10 = pnand %p1763_p9, %p1757_p6 }
0x17b3   :  { %v1290_v27 = vsub.f32 %v2138_v36, %v1282_v25  ;;  %v1281_v28 = vadd.f32 %v1272_v26, %v2148_v46 }
0x17b5   :  { %1298 = vst [vmem:[#allocation9 + $0x38] sm:$0xff] %v1290_v27  ;;  %v1289_v29 = vsub.f32 %v2140_v38, %v1281_v28 }
0x17b7   :  { %1297 = vst [vmem:[#allocation9 + $0x30] sm:$0xff] %v1289_v29 }
0x17b8   :  { %1767 = shalt.err (!%p1764_p10)
}
0x17b9   :  { %s1794_s10 = smov 128   ;;  %s1795_s25 = smov 8  }
0x17ba   :  { %1310 = dma.vmem_to_hbm [thread:$0]  %s1305_s24, 1024, %s2187_s8, [#allocation6], %s1794_s10, %s1794_s10, %s1795_s25  }
0x17bb   :  { %1780 = dma.done.wait [#allocation6], 1024  }
0x17bc   :  { %1781 = vsyncadd [#allocation6], 4294966272 }
0x17bd   :  { %1782 = dma.done.wait [#allocation11], 256  }
0x17be   :  { %1783 = vsyncadd [#allocation11], 4294967040 }
0x17bf   :  { %1340 = vsyncpa [#allocation5], 1 }
0x17c0   :  { %1341 = vsyncpa [#allocation8], 1 }
0x17c1   :  { %1342 = vsyncpa [#allocation6], 1 }
0x17c2   :  { %1343 = vsyncpa [#allocation11], 1 }

</bundles_post_ra>
